<compile_context>
chip_gen: v7x
topology: tpu7x:2x2x1
jax: 0.10.0
libtpu: 0.0.40
codegen_flags: <defaults>
</compile_context>

<pallas_src>
import functools

import jax
import jax.numpy as jnp
from jax.experimental import pallas as pl
from jax.experimental.pallas import tpu as pltpu

HIDDEN = 128   # trunk width == lane width, keeps everything (8,128)-aligned


def _round_up(n, m):
    return ((n + m - 1) // m) * m


def dueling_kernel(x_ref, w1_ref, b1_ref, w2_ref, b2_ref, wh_ref, bh_ref,
                   q_ref, *, ac):
    # x: (TB, obs) f32 (cast to bf16 here, fused with the first matmul);
    # weights bf16; biases f32; output bf16.
    x = x_ref[...].astype(jnp.bfloat16)

    # trunk: Linear -> ReLU -> Linear -> ReLU   (MXU matmuls, f32 accumulation)
    h1 = jnp.dot(x, w1_ref[...], preferred_element_type=jnp.float32) + b1_ref[...]
    h1 = jnp.maximum(h1, 0.0).astype(jnp.bfloat16)
    h2 = jnp.dot(h1, w2_ref[...], preferred_element_type=jnp.float32) + b2_ref[...]
    h2 = jnp.maximum(h2, 0.0).astype(jnp.bfloat16)

    # fused heads: columns [0:ac] = advantage, column ac = value, rest EXACTLY 0
    # (requires wh/bh padding to be exactly zero and f32 accumulation -- see
    # pack_params; breaks silently if the head weights are ever re-quantized).
    head = jnp.dot(h2, wh_ref[...], preferred_element_type=jnp.float32) + bh_ref[...]

    value = head[:, ac:ac + 1]                                   # (TB, 1)
    # Padded columns are exactly zero, so the full-lane reduce minus the value
    # column equals the sum over only the ac advantage columns.
    adv_mean = (jnp.sum(head, axis=1, keepdims=True) - value) * (1.0 / ac)

    # q = value + adv - mean(adv); fold into one broadcast: head + delta.
    # Columns >= ac are junk (col ac holds 2*value - mean); wrapper slices them off.
    delta = value - adv_mean                                     # (TB, 1)
    q_ref[...] = (head + delta).astype(q_ref.dtype)


def pack_params(params, *, obs, ac):
    """One-time host-side re-layout: fuse heads, cast matmul operands to bf16."""
    (w1, b1, w2, b2, wv, bv, wa, ba) = params
    assert ac + 1 <= HIDDEN, "fused head needs ac + 1 <= 128 (value column at index ac)"
    assert w1.shape == (obs, HIDDEN)
    # Fused head: columns [0:ac] = adv weights, column ac = value weights,
    # remaining columns MUST stay exactly zero (in-kernel mean trick relies on it).
    wh = (jnp.zeros((HIDDEN, HIDDEN), jnp.float32)
          .at[:, :ac].set(wa)
          .at[:, ac:ac + 1].set(wv))
    bh = (jnp.zeros((1, HIDDEN), jnp.float32)
          .at[:, :ac].set(ba)
          .at[:, ac:ac + 1].set(bv))
    return (w1.astype(jnp.bfloat16), b1.astype(jnp.float32),
            w2.astype(jnp.bfloat16), b2.astype(jnp.float32),
            wh.astype(jnp.bfloat16), bh.astype(jnp.float32))


def _dueling_forward_small(x, packed_params, *, ac):
    """Tiny-batch fast path: plain jnp, same precision recipe as the kernel."""
    w1, b1, w2, b2, wh, bh = packed_params
    bf = jnp.bfloat16
    h1 = jnp.maximum(
        jnp.dot(x.astype(bf), w1, preferred_element_type=jnp.float32) + b1, 0.0).astype(bf)
    h2 = jnp.maximum(
        jnp.dot(h1, w2, preferred_element_type=jnp.float32) + b2, 0.0).astype(bf)
    head = jnp.dot(h2, wh, preferred_element_type=jnp.float32) + bh
    value = head[:, ac:ac + 1]
    adv = head[:, :ac]
    return value + adv - jnp.mean(adv, axis=1, keepdims=True)


def _dueling_forward_pallas(x, packed_params, *, obs, ac, tile_b):
    w1, b1, w2, b2, wh, bh = packed_params
    B = x.shape[0]

    # Batch tile: multiple of 8 sublanes, capped at tile_b.  Sized so the grid
    # has >= 2 steps whenever B > 8, which lets the "parallel" batch axis shard
    # across v7x's two TensorCores (one extra ~0.35us grid step on v5e/v6e is
    # noise).  Per-tile VMEM at tb=1024: x 2x32KB, out 2x256KB, weights ~200KB.
    tb = max(8, min(tile_b, _round_up(pl.cdiv(B, 2), 8)))
    grid = (pl.cdiv(B, tb),)

    # Advisory cost hint for XLA's scheduler around the custom call.
    flops = int(2 * B * HIDDEN * (obs + 2 * HIDDEN) + 6 * B * HIDDEN)
    param_bytes = sum(int(a.size) * a.dtype.itemsize for a in (w1, b1, w2, b2, wh, bh))
    bytes_accessed = int(x.size) * x.dtype.itemsize + int(B) * HIDDEN * 2 + param_bytes

    resident = lambda shape: pl.BlockSpec(shape, lambda i: (0, 0))

    # If the Mosaic dump ever shows plain "parallel" not sharding across v7x
    # cores for this 1-D grid, switch to pltpu.CORE_PARALLEL.
    q = pl.pallas_call(
        functools.partial(dueling_kernel, ac=ac),
        out_shape=jax.ShapeDtypeStruct((B, HIDDEN), jnp.bfloat16),
        grid=grid,
        in_specs=[
            pl.BlockSpec((tb, obs), lambda i: (i, 0)),   # x: streamed per tile
            resident((obs, HIDDEN)),                     # w1  (VMEM-resident)
            resident((1, HIDDEN)),                       # b1
            resident((HIDDEN, HIDDEN)),                  # w2
            resident((1, HIDDEN)),                       # b2
            resident((HIDDEN, HIDDEN)),                  # fused head weights
            resident((1, HIDDEN)),                       # fused head bias
        ],
        out_specs=pl.BlockSpec((tb, HIDDEN), lambda i: (i, 0)),
        compiler_params=pltpu.CompilerParams(
            dimension_semantics=("parallel",)),
        cost_estimate=pl.CostEstimate(
            flops=flops, transcendentals=0, bytes_accessed=bytes_accessed),
    )(x, w1, b1, w2, b2, wh, bh)

    # Columns >= ac of the slab are intentionally garbage -- never consume q
    # before this slice.  Cast back to f32 for the (tiny) sliced Q-values.
    return q[:, :ac].astype(jnp.float32)


def dueling_forward(x, packed_params, *, obs, ac, tile_b=1024,
                    small_batch_threshold=32):
    """q_val = value + adv - adv.mean(1, keepdims=True); returns (B, ac) f32."""
    B = x.shape[0]
    if B <= small_batch_threshold:
        return _dueling_forward_small(x, packed_params, ac=ac)
    return _dueling_forward_pallas(x, packed_params, obs=obs, ac=ac, tile_b=tile_b)


def init_params(key, obs, ac):
    """Deterministic PyTorch-style uniform(-1/sqrt(fan_in), 1/sqrt(fan_in)) init.
    Weights stored transposed vs PyTorch, i.e. (in, out)."""
    def linear(key, fan_in, fan_out):
        kw, kb = jax.random.split(key)
        bound = 1.0 / jnp.sqrt(fan_in)
        w = jax.random.uniform(kw, (fan_in, fan_out), jnp.float32, -bound, bound)
        b = jax.random.uniform(kb, (1, fan_out), jnp.float32, -bound, bound)
        return w, b

    k1, k2, k3, k4 = jax.random.split(key, 4)
    w1, b1 = linear(k1, obs, HIDDEN)
    w2, b2 = linear(k2, HIDDEN, HIDDEN)
    wv, bv = linear(k3, HIDDEN, 1)
    wa, ba = linear(k4, HIDDEN, ac)
    return (w1, b1, w2, b2, wv, bv, wa, ba)


def reference_forward_f32(x, params):
    (w1, b1, w2, b2, wv, bv, wa, ba) = params
    h1 = jnp.maximum(x @ w1 + b1, 0.0)
    h2 = jnp.maximum(h1 @ w2 + b2, 0.0)
    value = h2 @ wv + bv
    adv = h2 @ wa + ba
    return value + adv - jnp.mean(adv, axis=1, keepdims=True)


def reference_forward_bf16(x, params):
    """Same precision recipe as the kernel: bf16 operands, f32 accumulation."""
    (w1, b1, w2, b2, wv, bv, wa, ba) = params
    bf = jnp.bfloat16
    h1 = jnp.dot(x.astype(bf), w1.astype(bf), preferred_element_type=jnp.float32) + b1
    h1 = jnp.maximum(h1, 0.0).astype(bf)
    h2 = jnp.dot(h1, w2.astype(bf), preferred_element_type=jnp.float32) + b2
    h2 = jnp.maximum(h2, 0.0).astype(bf)
    value = jnp.dot(h2, wv.astype(bf), preferred_element_type=jnp.float32) + bv
    adv = jnp.dot(h2, wa.astype(bf), preferred_element_type=jnp.float32) + ba
    return value + adv - jnp.mean(adv, axis=1, keepdims=True)


if __name__ == "__main__":
    # LunarLander-like sizes: obs=8, actions=4.
    OBS, AC = 8, 4

    key = jax.random.PRNGKey(0)
    kx1, kx2, kp = jax.random.split(key, 3)
    params = init_params(kp, OBS, AC)
    packed = pack_params(params, obs=OBS, ac=AC)

    # --- tiny inference batch (B=2): small-batch fast path -----------------
    x_small = jax.random.normal(kx1, (2, OBS), dtype=jnp.float32)
    q_small = jax.block_until_ready(dueling_forward(x_small, packed, obs=OBS, ac=AC))
    assert q_small.shape == (2, AC)
    assert jnp.allclose(q_small, reference_forward_bf16(x_small, params),
                        atol=2e-2, rtol=2e-2)
    assert jnp.allclose(q_small, reference_forward_f32(x_small, params),
                        atol=1e-1, rtol=1e-1)

    # --- same tiny batch forced through the Pallas path (single partial block)
    q_small_pl = jax.block_until_ready(
        dueling_forward(x_small, packed, obs=OBS, ac=AC, small_batch_threshold=0))
    assert q_small_pl.shape == (2, AC)
    assert jnp.allclose(q_small_pl, reference_forward_bf16(x_small, params),
                        atol=2e-2, rtol=2e-2)
    assert jnp.allclose(q_small_pl, reference_forward_f32(x_small, params),
                        atol=1e-1, rtol=1e-1)

    # --- training-style batch, non-multiple of the tile -> 2 grid steps + edge
    B2 = 200
    x_big = jax.random.normal(kx2, (B2, OBS), dtype=jnp.float32)
    q_big = jax.block_until_ready(dueling_forward(x_big, packed, obs=OBS, ac=AC))
    assert q_big.shape == (B2, AC)
    assert jnp.allclose(q_big, reference_forward_bf16(x_big, params),
                        atol=2e-2, rtol=2e-2)
    assert jnp.allclose(q_big, reference_forward_f32(x_big, params),
                        atol=1e-1, rtol=1e-1)

    print("KERNEL_OK")
</pallas_src>

<mosaic_0001>
module attributes {stable_mosaic.version = 11 : i64} {
  func.func @dueling_kernel(%arg0: i32, %arg1: memref<8x8xf32, #tpu.memory_space<vmem>>, %arg2: memref<8x128xbf16, #tpu.memory_space<vmem>>, %arg3: memref<1x128xf32, #tpu.memory_space<vmem>>, %arg4: memref<128x128xbf16, #tpu.memory_space<vmem>>, %arg5: memref<1x128xf32, #tpu.memory_space<vmem>>, %arg6: memref<128x128xbf16, #tpu.memory_space<vmem>>, %arg7: memref<1x128xf32, #tpu.memory_space<vmem>>, %arg8: memref<8x128xbf16, #tpu.memory_space<vmem>>) attributes {dimension_semantics = [#tpu.dimension_semantics<parallel>], iteration_bounds = array<i64: 1>, scalar_prefetch = 0 : i64, scratch_operands = 0 : i64, tpu.core_type = #tpu.core_type<tc>, window_params = [{transform_indices = @transform_0, window_bounds = array<i64: 8, 8>}, {pipeline_mode = #tpu.pipeline_mode<synchronous>, transform_indices = @transform_1, window_bounds = array<i64: 8, 128>}, {pipeline_mode = #tpu.pipeline_mode<synchronous>, transform_indices = @transform_2, window_bounds = array<i64: 1, 128>}, {pipeline_mode = #tpu.pipeline_mode<synchronous>, transform_indices = @transform_3, window_bounds = array<i64: 128, 128>}, {pipeline_mode = #tpu.pipeline_mode<synchronous>, transform_indices = @transform_4, window_bounds = array<i64: 1, 128>}, {pipeline_mode = #tpu.pipeline_mode<synchronous>, transform_indices = @transform_5, window_bounds = array<i64: 128, 128>}, {pipeline_mode = #tpu.pipeline_mode<synchronous>, transform_indices = @transform_6, window_bounds = array<i64: 1, 128>}, {transform_indices = @transform_7, window_bounds = array<i64: 8, 128>}]} {
    %c0 = arith.constant 0 : index
    %c0_0 = arith.constant 0 : index
    %0 = vector.load %arg1[%c0, %c0_0] : memref<8x8xf32, #tpu.memory_space<vmem>>, vector<8x8xf32>
    %1 = arith.truncf %0 : vector<8x8xf32> to vector<8x8xbf16>
    %c0_1 = arith.constant 0 : index
    %c0_2 = arith.constant 0 : index
    %2 = vector.load %arg2[%c0_1, %c0_2] : memref<8x128xbf16, #tpu.memory_space<vmem>>, vector<8x128xbf16>
    %cst = arith.constant dense<0.000000e+00> : vector<8x128xf32>
    %3 = tpu.matmul %1, %2, %cst {dimension_numbers = #tpu.dot_dimension_numbers<[1], [0], [0], [1], [0, 0, 1, 1], [], []>} : vector<8x8xbf16>, vector<8x128xbf16>, vector<8x128xf32> -> vector<8x128xf32>
    %c0_3 = arith.constant 0 : index
    %c0_4 = arith.constant 0 : index
    %4 = vector.load %arg3[%c0_3, %c0_4] : memref<1x128xf32, #tpu.memory_space<vmem>>, vector<1x128xf32>
    %5 = vector.broadcast %4 : vector<1x128xf32> to vector<8x128xf32>
    %6 = arith.addf %3, %5 : vector<8x128xf32>
    %cst_5 = arith.constant 0.000000e+00 : f32
    %7 = vector.broadcast %cst_5 : f32 to vector<8x128xf32>
    %8 = arith.maximumf %6, %7 : vector<8x128xf32>
    %9 = arith.truncf %8 : vector<8x128xf32> to vector<8x128xbf16>
    %c0_6 = arith.constant 0 : index
    %c0_7 = arith.constant 0 : index
    %10 = vector.load %arg4[%c0_6, %c0_7] : memref<128x128xbf16, #tpu.memory_space<vmem>>, vector<128x128xbf16>
    %cst_8 = arith.constant dense<0.000000e+00> : vector<8x128xf32>
    %11 = tpu.matmul %9, %10, %cst_8 {dimension_numbers = #tpu.dot_dimension_numbers<[1], [0], [0], [1], [0, 0, 1, 1], [], []>} : vector<8x128xbf16>, vector<128x128xbf16>, vector<8x128xf32> -> vector<8x128xf32>
    %c0_9 = arith.constant 0 : index
    %c0_10 = arith.constant 0 : index
    %12 = vector.load %arg5[%c0_9, %c0_10] : memref<1x128xf32, #tpu.memory_space<vmem>>, vector<1x128xf32>
    %13 = vector.broadcast %12 : vector<1x128xf32> to vector<8x128xf32>
    %14 = arith.addf %11, %13 : vector<8x128xf32>
    %cst_11 = arith.constant 0.000000e+00 : f32
    %15 = vector.broadcast %cst_11 : f32 to vector<8x128xf32>
    %16 = arith.maximumf %14, %15 : vector<8x128xf32>
    %17 = arith.truncf %16 : vector<8x128xf32> to vector<8x128xbf16>
    %c0_12 = arith.constant 0 : index
    %c0_13 = arith.constant 0 : index
    %18 = vector.load %arg6[%c0_12, %c0_13] : memref<128x128xbf16, #tpu.memory_space<vmem>>, vector<128x128xbf16>
    %cst_14 = arith.constant dense<0.000000e+00> : vector<8x128xf32>
    %19 = tpu.matmul %17, %18, %cst_14 {dimension_numbers = #tpu.dot_dimension_numbers<[1], [0], [0], [1], [0, 0, 1, 1], [], []>} : vector<8x128xbf16>, vector<128x128xbf16>, vector<8x128xf32> -> vector<8x128xf32>
    %c0_15 = arith.constant 0 : index
    %c0_16 = arith.constant 0 : index
    %20 = vector.load %arg7[%c0_15, %c0_16] : memref<1x128xf32, #tpu.memory_space<vmem>>, vector<1x128xf32>
    %21 = vector.broadcast %20 : vector<1x128xf32> to vector<8x128xf32>
    %22 = arith.addf %19, %21 : vector<8x128xf32>
    %23 = vector.extract_strided_slice %22 {offsets = [0, 4], sizes = [8, 1], strides = [1, 1]} : vector<8x128xf32> to vector<8x1xf32>
    %cst_17 = arith.constant dense<0.000000e+00> : vector<8xf32>
    %24 = vector.multi_reduction <add>, %22, %cst_17 [1] : vector<8x128xf32> to vector<8xf32>
    %25 = vector.shape_cast %24 : vector<8xf32> to vector<8x1xf32>
    %26 = arith.subf %25, %23 : vector<8x1xf32>
    %cst_18 = arith.constant 2.500000e-01 : f32
    %27 = vector.broadcast %cst_18 : f32 to vector<8x1xf32>
    %28 = arith.mulf %26, %27 : vector<8x1xf32>
    %29 = arith.subf %23, %28 : vector<8x1xf32>
    %30 = vector.broadcast %29 : vector<8x1xf32> to vector<8x128xf32>
    %31 = arith.addf %22, %30 : vector<8x128xf32>
    %32 = arith.truncf %31 : vector<8x128xf32> to vector<8x128xbf16>
    %c0_19 = arith.constant 0 : index
    %c0_20 = arith.constant 0 : index
    %33 = vector.load %arg8[%c0_19, %c0_20] : memref<8x128xbf16, #tpu.memory_space<vmem>>, vector<8x128xbf16>
    tpu.vector_store %arg8[%c0_19, %c0_20], %32 {strides = array<i32>} : memref<8x128xbf16, #tpu.memory_space<vmem>>, vector<8x128xbf16>,
    return
  }
  func.func @transform_0(%arg0: i32) -> (i32, i32) {
    %c0_i32 = arith.constant 0 : i32
    %c0_i32_0 = arith.constant 0 : i32
    return %arg0, %c0_i32 : i32, i32
  }
  func.func @transform_1(%arg0: i32) -> (i32, i32) {
    %c0_i32 = arith.constant 0 : i32
    %c0_i32_0 = arith.constant 0 : i32
    %c0_i32_1 = arith.constant 0 : i32
    return %c0_i32, %c0_i32_0 : i32, i32
  }
  func.func @transform_2(%arg0: i32) -> (i32, i32) {
    %c0_i32 = arith.constant 0 : i32
    %c0_i32_0 = arith.constant 0 : i32
    %c0_i32_1 = arith.constant 0 : i32
    return %c0_i32, %c0_i32_0 : i32, i32
  }
  func.func @transform_3(%arg0: i32) -> (i32, i32) {
    %c0_i32 = arith.constant 0 : i32
    %c0_i32_0 = arith.constant 0 : i32
    %c0_i32_1 = arith.constant 0 : i32
    return %c0_i32, %c0_i32_0 : i32, i32
  }
  func.func @transform_4(%arg0: i32) -> (i32, i32) {
    %c0_i32 = arith.constant 0 : i32
    %c0_i32_0 = arith.constant 0 : i32
    %c0_i32_1 = arith.constant 0 : i32
    return %c0_i32, %c0_i32_0 : i32, i32
  }
  func.func @transform_5(%arg0: i32) -> (i32, i32) {
    %c0_i32 = arith.constant 0 : i32
    %c0_i32_0 = arith.constant 0 : i32
    %c0_i32_1 = arith.constant 0 : i32
    return %c0_i32, %c0_i32_0 : i32, i32
  }
  func.func @transform_6(%arg0: i32) -> (i32, i32) {
    %c0_i32 = arith.constant 0 : i32
    %c0_i32_0 = arith.constant 0 : i32
    %c0_i32_1 = arith.constant 0 : i32
    return %c0_i32, %c0_i32_0 : i32, i32
  }
  func.func @transform_7(%arg0: i32) -> (i32, i32) {
    %c0_i32 = arith.constant 0 : i32
    %c0_i32_0 = arith.constant 0 : i32
    return %arg0, %c0_i32 : i32, i32
  }
}

</mosaic_0001>

<bundles_post_ra>
// kernel: tpu_custom_call.1
= control target key start
LH: loop header
LB: loop body
LE: loop exit
PB: predicated region body
PF: predicated region fallthrough
CT: control target
= control target key end

     0   :  { %12 = vsyncpa [#allocation3], 0  ;;  %s822_s0 = inlined_call_operand.hbm [shape: f32[2,8], index: 0, kind: input, shape index: {}]   ;;  %s823_s1 = inlined_call_operand.hbm [shape: bf16[8,128], index: 1, kind: input, shape index: {}]   ;;  %s824_s2 = inlined_call_operand.vmem [shape: f32[1,128], index: 2, kind: input, shape index: {}]   ;;  %s825_s3 = inlined_call_operand.hbm [shape: bf16[128,128], index: 3, kind: input, shape index: {}]   ;;  %s826_s4 = inlined_call_operand.vmem [shape: f32[1,128], index: 4, kind: input, shape index: {}]   ;;  %s827_s5 = inlined_call_operand.hbm [shape: bf16[128,128], index: 5, kind: input, shape index: {}]   ;;  %s828_s6 = inlined_call_operand.vmem [shape: f32[1,128], index: 6, kind: input, shape index: {}]   ;;  %s829_s7 = inlined_call_operand.hbm [shape: bf16[2,128], index: 7, kind: output, shape index: {}]  }
   0x1   :  { %13 = vsyncpa [#allocation6], 0 }
   0x2   :  { %14 = vsyncpa [#allocation9], 0 }
   0x3   :  { %15 = vsyncpa [#allocation4], 0 }
   0x4   :  { %20 = vsyncadd [#allocation3], 96  ;;  %s667_s24 = smov [#allocation5]   ;;  %s668_s26 = smov [#allocation2]  }
   0x5   :  { %s34_s25 = sshll.u32 %s667_s24, 4  ;;  %s21_s27 = sshll.u32 %s668_s26, 4  ;;  %s35_s25 = int_to_ptr.vmem [resolvable:$true] %s34_s25  ;;  %s722_s27 = int_to_ptr.vmem [resolvable:$true] %s21_s27 }
   0x6   :  { %s549_s30 = scalar_lea.hbm %s823_s1, 64 }
   0x7   :  { %p550_p0 = scmp.ne.s32.totalorder %s823_s1, %s549_s30  ;;  %p553_p1 = scmp.lt.u32.totalorder %s549_s30, %s823_s1 }
   0x9   :  { %p555_p2 = pnand %p553_p1, %p550_p0 }
   0xb   :  { %558 = shalt.err (!%p555_p2)
}
   0xc   :  { %s559_s12 = scalar_lea.vmem %s35_s25, 64  ;;  %p564_p4 = scmp.lt.s32.totalorder %s35_s25, %s35_s25 }
   0xd   :  { %p560_p3 = scmp.ne.s32.totalorder %s35_s25, %s559_s12  ;;  %p565_p5 = scmp.lt.s32.totalorder %s559_s12, %s559_s12 }
   0xf   :  { %p566_p6 = por %p565_p5, %p564_p4 }
  0x11   :  { %p567_p7 = pnand %p566_p6, %p560_p3 }
  0x13   :  { %570 = shalt.err (!%p567_p7)
}
  0x14   :  { %37 = dma.hbm_to_vmem [thread:$0]  %s823_s1, 64, %s35_s25, [#allocation6]  }
  0x15   :  { %s571_s17 = scalar_lea.hbm %s822_s0, 32 }
  0x16   :  { %p572_p8 = scmp.ne.s32.totalorder %s822_s0, %s571_s17  ;;  %p575_p9 = scmp.lt.u32.totalorder %s571_s17, %s822_s0 }
  0x18   :  { %p577_p10 = pnand %p575_p9, %p572_p8 }
  0x1a   :  { %580 = shalt.err (!%p577_p10)
}
  0x1b   :  { %s581_s22 = scalar_lea.vmem %s722_s27, 32  ;;  %s585_s1 = scalar_lea.vmem %s722_s27, 128 }
  0x1c   :  { %p582_p11 = scmp.ne.s32.totalorder %s722_s27, %s581_s22  ;;  %p586_p12 = scmp.lt.s32.totalorder %s722_s27, %s722_s27 }
  0x1d   :  { %p587_p13 = scmp.lt.s32.totalorder %s585_s1, %s581_s22 }
  0x1f   :  { %p588_p0 = por %p587_p13, %p586_p12 }
  0x21   :  { %p589_p1 = pnand %p588_p0, %p582_p11 }
  0x23   :  { %592 = shalt.err (!%p589_p1)
}
  0x24   :  { %s669_s23 = smov 32   ;;  %s670_s24 = smov 2  }
  0x25   :  { %27 = dma.hbm_to_vmem [thread:$0]  %s822_s0, 32, %s722_s27, [#allocation3], %s669_s23, %s669_s23, %s670_s24  }
  0x26   :  { %s671_s28 = smov [#allocation7]   ;;  %s593_s9 = scalar_lea.hbm %s825_s3, 1024 }
  0x27   :  { %s45_s29 = sshll.u32 %s671_s28, 4  ;;  %p594_p2 = scmp.ne.s32.totalorder %s825_s3, %s593_s9  ;;  %s46_s29 = int_to_ptr.vmem [resolvable:$true] %s45_s29 }
  0x28   :  { %p597_p3 = scmp.lt.u32.totalorder %s593_s9, %s825_s3 }
  0x2a   :  { %p599_p4 = pnand %p597_p3, %p594_p2 }
  0x2c   :  { %602 = shalt.err (!%p599_p4)
}
  0x2d   :  { %s603_s14 = scalar_lea.vmem %s46_s29, 1024  ;;  %p608_p6 = scmp.lt.s32.totalorder %s46_s29, %s46_s29 }
  0x2e   :  { %p604_p5 = scmp.ne.s32.totalorder %s46_s29, %s603_s14  ;;  %p609_p7 = scmp.lt.s32.totalorder %s603_s14, %s603_s14 }
  0x30   :  { %p610_p8 = por %p609_p7, %p608_p6 }
  0x32   :  { %p611_p9 = pnand %p610_p8, %p604_p5 }
  0x34   :  { %614 = shalt.err (!%p611_p9)
}
  0x35   :  { %s672_s0 = smov 64   ;;  %s673_s27 = smov 4  }
  0x36   :  { %51 = dma.hbm_to_vmem [thread:$0]  %s825_s3, 1024, %s46_s29, [#allocation6], %s672_s0, %s672_s0, %s673_s27  }
  0x37   :  { %s674_s17 = smov [#allocation8]   ;;  %s615_s21 = scalar_lea.hbm %s827_s5, 1024 }
  0x38   :  { %s59_s18 = sshll.u32 %s674_s17, 4  ;;  %p616_p10 = scmp.ne.s32.totalorder %s827_s5, %s615_s21  ;;  %s60_s18 = int_to_ptr.vmem [resolvable:$true] %s59_s18 }
  0x39   :  { %p619_p11 = scmp.lt.u32.totalorder %s615_s21, %s827_s5 }
  0x3b   :  { %p621_p12 = pnand %p619_p11, %p616_p10 }
  0x3d   :  { %624 = shalt.err (!%p621_p12)
}
  0x3e   :  { %s625_s25 = scalar_lea.vmem %s60_s18, 1024  ;;  %p630_p0 = scmp.lt.s32.totalorder %s60_s18, %s60_s18 }
  0x3f   :  { %p626_p13 = scmp.ne.s32.totalorder %s60_s18, %s625_s25  ;;  %p631_p1 = scmp.lt.s32.totalorder %s625_s25, %s625_s25 }
  0x41   :  { %p632_p2 = por %p631_p1, %p630_p0 }
  0x43   :  { %p633_p3 = pnand %p632_p2, %p626_p13 }
  0x45   :  { %636 = shalt.err (!%p633_p3)
}
  0x46   :  { %65 = dma.hbm_to_vmem [thread:$0]  %s827_s5, 1024, %s60_s18, [#allocation9], %s672_s0, %s672_s0, %s673_s27  }
  0x47   :  { %659 = dma.done.wait [#allocation3], 128  }
  0x48   :  { %660 = vsyncadd [#allocation3], 4294967168 }
  0x49   :  { %661 = dma.done.wait [#allocation6], 1088  }
  0x4a   :  { %662 = vsyncadd [#allocation6], 4294966208 }
  0x4b   :  { %663 = dma.done.wait [#allocation9], 1024  }
  0x4c   :  { %664 = vsyncadd [#allocation9], 4294966272  ;;  %v675_v0 = vmov 0.0   ;;  %vm676_vm0 = vmmov 0   ;;  %vm95_vm1 = vcmask 1043456   ;;  %v81_v2 = vld [vmem:[#allocation2] sm:$0xff]  ;;  %v381_v50 = vlaneseq }
  0x4d   :  { %471 = vmatprep.subr.bf16.mxu0 %v675_v0  ;;  %473 = vmatprep.mubr.msk.bf16.mxu0 %vm676_vm0, %v675_v0  ;;  %v83_v1 = vld [vmem:[#allocation5] sm:$0xf]  ;;  %v82_v4 = vpack.c.bf16 %v81_v2, %v81_v2  ;;  %v533_v5 = vld [vmem:[#allocation7] sm:$0xff]   ;;  %vm91_vm2 = vcmask 64512   ;;  %v534_v6 = vld [vmem:[#allocation7 + $0x8] sm:$0xff]   ;;  %v677_v43 = vmov 4  }
  0x4e   :  { %477 = vmatprep.subr.bf16.mxu1 %v675_v0  ;;  %493 = vmatprep.mubr.msk.bf16.mxu1 %vm676_vm0, %v675_v0  ;;  %v97_v3 = vsel %vm95_vm1, %v83_v1, 0  ;;  %v535_v7 = vld [vmem:[#allocation7 + $0x10] sm:$0xff]   ;;  %v536_v8 = vld [vmem:[#allocation7 + $0x18] sm:$0xff]   ;;  %v537_v9 = vld [vmem:[#allocation7 + $0x20] sm:$0xff]   ;;  %v678_v48 = vmov 1966171168  }
  0x4f   :  { %472 = vmatpush3.bf16.msra.mxu0 %v97_v3  ;;  %478 = vmatpush3.bf16.msra.mxu1 %v533_v5  ;;  %v538_v10 = vld [vmem:[#allocation7 + $0x28] sm:$0xff]   ;;  %v539_v11 = vld [vmem:[#allocation7 + $0x30] sm:$0xff]   ;;  %v540_v12 = vld [vmem:[#allocation7 + $0x38] sm:$0xff]   ;;  %v379_v49 = vunpack.c.l.s4 %v678_v48  ;;  %v382_v52 = vshrl.u32 %v381_v50, 7 }
  0x50   :  { %497 = vmatprep.subr.bf16.mxu0 %v675_v0  ;;  %479 = vmatprep.subr.bf16.mxu1 %v675_v0  ;;  %v541_v13 = vld [vmem:[#allocation8] sm:$0xff]   ;;  %v542_v14 = vld [vmem:[#allocation8 + $0x8] sm:$0xff]   ;;  %v543_v15 = vld [vmem:[#allocation8 + $0x10] sm:$0xff]  }
  0x51   :  { %v544_v16 = vld [vmem:[#allocation8 + $0x18] sm:$0xff]   ;;  %v545_v17 = vld [vmem:[#allocation8 + $0x20] sm:$0xff]   ;;  %v546_v18 = vld [vmem:[#allocation8 + $0x28] sm:$0xff]   ;;  %532 = vset.pattern.permute.xlu0 %v677_v43  ;;  %v380_v51 = vunpack.c.0.s8 %v379_v49 }
  0x52   :  { %474 = vmatmul.mubr.msk.bf16.vlgmr.msra.gmra.mrb[0].mxu0 %vm91_vm2, %v82_v4  ;;  %v429_v19 = vld [vmem:[%s824_s2] ss:$0 sm:$0xff]  ;;  %v548_v28 = vld [vmem:[#allocation8 + $0x38] sm:$0xff]  }
  0x53   :  { %513 = vmatprep.mubr.msk.bf16.mxu0 %vm676_vm0, %v675_v0  ;;  %480 = vmatpush3.bf16.msra.mxu1 %v534_v6  ;;  %v547_v27 = vld [vmem:[#allocation8 + $0x30] sm:$0xff]   ;;  %v383_v54 = vsub.s32 %v380_v51, %v382_v52 }
  0x54   :  { %481 = vmatprep.subr.bf16.mxu1 %v675_v0  ;;  %498 = vmatpush3.bf16.msra.mxu0 %v541_v13  ;;  %v431_v29 = vld [vmem:[%s826_s4] ss:$0 sm:$0xff] }
  0x55   :  { %499 = vmatprep.subr.bf16.mxu0 %v675_v0  ;;  %v440_v37 = vld [vmem:[%s828_s6] ss:$0 sm:$0xff] }
  0x57   :  { %482 = vmatpush3.bf16.msra.mxu1 %v535_v7 }
  0x58   :  { %483 = vmatprep.subr.bf16.mxu1 %v675_v0  ;;  %500 = vmatpush3.bf16.msra.mxu0 %v542_v14 }
  0x59   :  { %501 = vmatprep.subr.bf16.mxu0 %v675_v0 }
  0x5b   :  { %484 = vmatpush3.bf16.msra.mxu1 %v536_v8 }
  0x5c   :  { %485 = vmatprep.subr.bf16.mxu1 %v675_v0  ;;  %502 = vmatpush3.bf16.msra.mxu0 %v543_v15 }
  0x5d   :  { %503 = vmatprep.subr.bf16.mxu0 %v675_v0 }
  0x5f   :  { %486 = vmatpush3.bf16.msra.mxu1 %v537_v9 }
  0x60   :  { %487 = vmatprep.subr.bf16.mxu1 %v675_v0  ;;  %504 = vmatpush3.bf16.msra.mxu0 %v544_v16 }
  0x61   :  { %505 = vmatprep.subr.bf16.mxu0 %v675_v0 }
  0x63   :  { %488 = vmatpush3.bf16.msra.mxu1 %v538_v10 }
  0x64   :  { %489 = vmatprep.subr.bf16.mxu1 %v675_v0  ;;  %506 = vmatpush3.bf16.msra.mxu0 %v545_v17 }
  0x65   :  { %507 = vmatprep.subr.bf16.mxu0 %v675_v0 }
  0x67   :  { %490 = vmatpush3.bf16.msra.mxu1 %v539_v11 }
  0x68   :  { %491 = vmatprep.subr.bf16.mxu1 %v675_v0  ;;  %508 = vmatpush3.bf16.msra.mxu0 %v546_v18 }
  0x69   :  { %509 = vmatprep.subr.bf16.mxu0 %v675_v0 }
  0x6b   :  { %492 = vmatpush3.bf16.msra.mxu1 %v540_v12 }
  0x6c   :  { %510 = vmatpush3.bf16.msra.mxu0 %v547_v27 }
  0x6d   :  { %511 = vmatprep.subr.bf16.mxu0 %v675_v0 }
  0x70   :  { %512 = vmatpush3.bf16.msra.mxu0 %v548_v28 }
 0x125   :  { %v133_v20 = vpop.f32.mrb[0].mxu0 }
 0x126   :  { %v134_v21 = vadd.f32 %v429_v19, %v133_v20  ;;  %v475_v22 = vpop.f32.mrb[1].mxu0 }
 0x127   :  { %v136_v23 = vpop.f32.mrb[2].mxu0 }
 0x128   :  { %v139_v24 = vmax.f32 %v134_v21, 0.0  ;;  %v476_v25 = vpop.f32.mrb[3].mxu0 }
 0x12a   :  { %v140_v26 = vpack.c.bf16 %v139_v24, %v139_v24 }
 0x12c   :  { %494 = vmatmul.mubr.bf16.vlgmr.msra.gmra.mrb[0].mxu1 %v140_v26 }
 0x1ff   :  { %v246_v30 = vpop.f32.mrb[0].mxu1 }
 0x200   :  { %v247_v31 = vadd.f32 %v431_v29, %v246_v30  ;;  %v495_v32 = vpop.f32.mrb[1].mxu1 }
 0x201   :  { %v249_v33 = vpop.f32.mrb[2].mxu1 }
 0x202   :  { %v252_v34 = vmax.f32 %v247_v31, 0.0  ;;  %v496_v35 = vpop.f32.mrb[3].mxu1 }
 0x204   :  { %v253_v36 = vpack.c.bf16 %v252_v34, %v252_v34 }
 0x206   :  { %514 = vmatmul.mubr.bf16.vlgmr.msra.gmra.mrb[4].mxu0 %v253_v36 }
 0x2d9   :  { %v359_v38 = vpop.f32.mrb[4].mxu0 }
 0x2da   :  { %v360_v39 = vadd.f32 %v440_v37, %v359_v38  ;;  %v515_v40 = vpop.f32.mrb[5].mxu0 }
 0x2db   :  { %v362_v41 = vpop.f32.mrb[6].mxu0 }
 0x2dc   :  { %365 = vadd.xlane.f32.xlu0 %v360_v39  ;;  %v516_v42 = vpop.f32.mrb[7].mxu0 }
 0x369   :  { %v366_v44 = vpop.xlane.xlu0 %365 }
 0x36a   :  { %v367_v45 = vsub.f32 %v366_v44, %v360_v39 }
 0x36c   :  { %v368_v46 = vmul.f32 0.25, %v367_v45 }
 0x36e   :  { %v369_v47 = vsub.f32 %v360_v39, %v368_v46 }
 0x370   :  { %372 = vperm.xlu0 %532, %v369_v47  }
 0x3ef   :  { %v373_v53 = vpop.permute.xlu0 %372 }
 0x3f0   :  { %v375_v55 = vadd.f32 %v373_v53, %v360_v39 }
 0x3f2   :  { %v376_v56 = vpack.c.bf16 %v375_v55, %v375_v55 }
 0x3f4   :  { %v384_v57 = vrot.slane %v376_v56, %v383_v54 }
 0x3f6   :  { %v385_v58 = vcombine.high %v384_v57, %v384_v57  ;;  %v392_v59 = vrot.slane %v384_v57, %v383_v54  ;;  %449 = vst.sshfl [vmem:[#allocation10] sm:$0x1 pattern:$0x73625140] %v384_v57 }
 0x3f8   :  { %v399_v60 = vrot.slane %v385_v58, %v383_v54  ;;  %v400_v61 = vcombine.high %v392_v59, %v392_v59  ;;  %450 = vst.sshfl [vmem:[#allocation10 + $0x1] sm:$0x1 pattern:$0x73625140] %v385_v58 }
 0x3fa   :  { %v401_v62 = vcombine.high %v399_v60, %v399_v60  ;;  %408 = vst [vmem:[#allocation10 + $0x2] sm:$0x1] %v400_v61 }
 0x3fc   :  { %409 = vst [vmem:[#allocation10 + $0x3] sm:$0x1] %v401_v62 }
 0x3fd   :  { %414 = vsyncadd [#allocation4], 48  ;;  %s679_s4 = smov [#allocation10]  }
 0x3fe   :  { %s415_s6 = sshll.u32 %s679_s4, 4  ;;  %s416_s6 = int_to_ptr.vmem [resolvable:$true] %s415_s6 }
 0x3ff   :  { %s637_s9 = scalar_lea.vmem %s416_s6, 16  ;;  %s641_s10 = scalar_lea.vmem %s416_s6, 64 }
 0x400   :  { %p638_p4 = scmp.ne.s32.totalorder %s416_s6, %s637_s9  ;;  %p642_p5 = scmp.lt.s32.totalorder %s416_s6, %s416_s6 }
 0x401   :  { %p643_p6 = scmp.lt.s32.totalorder %s641_s10, %s637_s9 }
 0x403   :  { %p644_p7 = por %p643_p6, %p642_p5 }
 0x405   :  { %p645_p8 = pnand %p644_p7, %p638_p4 }
 0x407   :  { %648 = shalt.err (!%p645_p8)
}
 0x408   :  { %s649_s13 = scalar_lea.hbm %s829_s7, 16 }
 0x409   :  { %p650_p9 = scmp.ne.s32.totalorder %s829_s7, %s649_s13  ;;  %p653_p10 = scmp.lt.u32.totalorder %s649_s13, %s829_s7 }
 0x40b   :  { %p655_p11 = pnand %p653_p10, %p650_p9 }
 0x40d   :  { %658 = shalt.err (!%p655_p11)
}
 0x40e   :  { %s680_s16 = smov 16   ;;  %s681_s17 = smov 1  }
 0x40f   :  { %421 = dma.vmem_to_hbm [thread:$0]  %s416_s6, 16, %s829_s7, [#allocation4], %s680_s16, %s680_s16, %s681_s17  }
 0x410   :  { %665 = dma.done.wait [#allocation4], 64  }
 0x411   :  { %666 = vsyncadd [#allocation4], 4294967232 }
 0x412   :  { %425 = vsyncpa [#allocation3], 1 }
 0x413   :  { %426 = vsyncpa [#allocation6], 1 }
 0x414   :  { %427 = vsyncpa [#allocation9], 1 }
 0x415   :  { %428 = vsyncpa [#allocation4], 1 }

</bundles_post_ra>
